<compile_context>
chip_gen: v7x
topology: tpu7x:2x2x1
jax: 0.10.0
libtpu: 0.0.40
codegen_flags: <defaults>
</compile_context>

<pallas_src>
import jax
import jax.numpy as jnp
from jax.experimental import pallas as pl
from jax.experimental.pallas import tpu as pltpu


def mlp_kernel(x_ref, w1_ref, b1_ref, w2_ref, b2_ref, w3_ref, b3_ref, o_ref):
    # fc1 -> relu -> fc2 -> relu -> fc3, all VMEM-resident, bf16 MXU / f32 acc.
    x = x_ref[...]                                                     # bf16 (bt, 784)
    h1 = jnp.dot(x, w1_ref[...], preferred_element_type=jnp.float32)
    h1 = jnp.maximum(h1 + b1_ref[...], 0.0)                            # fused bias+ReLU (f32)
    h2 = jnp.dot(h1.astype(jnp.bfloat16), w2_ref[...],
                 preferred_element_type=jnp.float32)
    h2 = jnp.maximum(h2 + b2_ref[...], 0.0)
    o = jnp.dot(h2.astype(jnp.bfloat16), w3_ref[...],
                preferred_element_type=jnp.float32)
    o_ref[...] = o + b3_ref[...]


def _round_up(n, m):
    return ((n + m - 1) // m) * m


def _choose_batch_tile(B):
    # Prefer multiples of 16 (bf16 sublane packing), <= 512 rows, and at least
    # 2 grid steps so the "parallel" batch axis can be split across the two
    # TensorCores on v7x.
    for t in (512, 256, 128, 64, 32, 16):
        if B % t == 0 and B // t >= 2:
            return t
    for t in (512, 256, 128, 64, 32, 16):
        if B % t == 0:
            return t
    return B  # full-extent block is always a legal BlockSpec


def _pad2(a, rows, cols):
    r, c = a.shape
    return jnp.pad(a, ((0, rows - r), (0, cols - c)))


def mlp_forward(x, params, *, batch_tile=None):
    w1, b1, w2, b2, w3, b3 = params
    B, D_in = x.shape
    H1, H2, D_out = w1.shape[1], w2.shape[1], w3.shape[1]

    if batch_tile is None:
        batch_tile = _choose_batch_tile(B)
    assert B % batch_tile == 0, "batch must be divisible by batch_tile"

    # Pad feature dims to 128 lanes (zero padding -> contributes nothing).
    H1p, H2p, Dop = _round_up(H1, 128), _round_up(H2, 128), _round_up(D_out, 128)

    bf = jnp.bfloat16
    xb = x.astype(bf)
    w1p = _pad2(w1, D_in, H1p).astype(bf)
    w2p = _pad2(w2, H1p, H2p).astype(bf)
    w3p = _pad2(w3, H2p, Dop).astype(bf)
    b1p = _pad2(b1, 1, H1p).astype(jnp.float32)
    b2p = _pad2(b2, 1, H2p).astype(jnp.float32)
    b3p = _pad2(b3, 1, Dop).astype(jnp.float32)

    grid = (B // batch_tile,)

    # Tile over batch only; padded weights/biases (~0.3 MiB bf16 total) use a
    # constant index_map so they stay resident across grid steps.
    # (Default double-buffering of the weights is well within VMEM, so we skip
    #  pl.Buffered(1) to keep the lowering maximally portable.)
    in_specs = [
        pl.BlockSpec((batch_tile, D_in), lambda i: (i, 0)),   # x
        pl.BlockSpec((D_in, H1p), lambda i: (0, 0)),          # w1
        pl.BlockSpec((1, H1p), lambda i: (0, 0)),             # b1
        pl.BlockSpec((H1p, H2p), lambda i: (0, 0)),           # w2
        pl.BlockSpec((1, H2p), lambda i: (0, 0)),             # b2
        pl.BlockSpec((H2p, Dop), lambda i: (0, 0)),           # w3
        pl.BlockSpec((1, Dop), lambda i: (0, 0)),             # b3
    ]
    out_spec = pl.BlockSpec((batch_tile, Dop), lambda i: (i, 0))  # lane-dense output

    out_padded = pl.pallas_call(
        mlp_kernel,
        out_shape=jax.ShapeDtypeStruct((B, Dop), jnp.float32),
        grid_spec=pltpu.PrefetchScalarGridSpec(
            num_scalar_prefetch=0,
            grid=grid,
            in_specs=in_specs,
            out_specs=out_spec,
        ),
        compiler_params=pltpu.CompilerParams(
            dimension_semantics=("parallel",)
        ),
    )(xb, w1p, b1p, w2p, b2p, w3p, b3p)

    return out_padded[:, :D_out]


def init_params(key):
    """Deterministic init mirroring nn.Linear's U(-1/sqrt(fan_in), 1/sqrt(fan_in))."""
    dims = [(784, 100), (100, 100), (100, 10)]
    params = []
    for (fan_in, fan_out) in dims:
        key, kw, kb = jax.random.split(key, 3)
        bound = 1.0 / jnp.sqrt(jnp.float32(fan_in))
        w = jax.random.uniform(kw, (fan_in, fan_out), jnp.float32, -bound, bound)
        b = jax.random.uniform(kb, (1, fan_out), jnp.float32, -bound, bound)
        params += [w, b]
    return tuple(params)


def mlp_reference(x, params):
    """Reference with the same bf16-operand / f32-accumulate math as the kernel."""
    w1, b1, w2, b2, w3, b3 = params
    bf = jnp.bfloat16
    h1 = jnp.maximum(
        jnp.dot(x.astype(bf), w1.astype(bf), preferred_element_type=jnp.float32) + b1, 0.0)
    h2 = jnp.maximum(
        jnp.dot(h1.astype(bf), w2.astype(bf), preferred_element_type=jnp.float32) + b2, 0.0)
    return jnp.dot(h2.astype(bf), w3.astype(bf), preferred_element_type=jnp.float32) + b3


if __name__ == "__main__":
    key = jax.random.PRNGKey(0)
    kx, kp = jax.random.split(key)

    B = 32  # small batch; tile chooser picks batch_tile=16 -> 2 grid steps
    x = jax.random.normal(kx, (B, 784), jnp.float32)
    params = init_params(kp)

    out = jax.block_until_ready(mlp_forward(x, params))

    ref = mlp_reference(x, params)
    assert out.shape == (B, 10)
    assert jnp.allclose(out, ref, atol=1e-2, rtol=1e-2), float(jnp.max(jnp.abs(out - ref)))

    print("KERNEL_OK")
</pallas_src>

<mosaic_0001>
module attributes {stable_mosaic.version = 11 : i64} {
  func.func @mlp_kernel(%arg0: i32, %arg1: memref<16x784xbf16, #tpu.memory_space<vmem>>, %arg2: memref<784x128xbf16, #tpu.memory_space<vmem>>, %arg3: memref<1x128xf32, #tpu.memory_space<vmem>>, %arg4: memref<128x128xbf16, #tpu.memory_space<vmem>>, %arg5: memref<1x128xf32, #tpu.memory_space<vmem>>, %arg6: memref<128x128xbf16, #tpu.memory_space<vmem>>, %arg7: memref<1x128xf32, #tpu.memory_space<vmem>>, %arg8: memref<16x128xf32, #tpu.memory_space<vmem>>) attributes {dimension_semantics = [#tpu.dimension_semantics<parallel>], iteration_bounds = array<i64: 2>, scalar_prefetch = 0 : i64, scratch_operands = 0 : i64, tpu.core_type = #tpu.core_type<tc>, window_params = [{transform_indices = @transform_0, window_bounds = array<i64: 16, 784>}, {pipeline_mode = #tpu.pipeline_mode<synchronous>, transform_indices = @transform_1, window_bounds = array<i64: 784, 128>}, {pipeline_mode = #tpu.pipeline_mode<synchronous>, transform_indices = @transform_2, window_bounds = array<i64: 1, 128>}, {pipeline_mode = #tpu.pipeline_mode<synchronous>, transform_indices = @transform_3, window_bounds = array<i64: 128, 128>}, {pipeline_mode = #tpu.pipeline_mode<synchronous>, transform_indices = @transform_4, window_bounds = array<i64: 1, 128>}, {pipeline_mode = #tpu.pipeline_mode<synchronous>, transform_indices = @transform_5, window_bounds = array<i64: 128, 128>}, {pipeline_mode = #tpu.pipeline_mode<synchronous>, transform_indices = @transform_6, window_bounds = array<i64: 1, 128>}, {transform_indices = @transform_7, window_bounds = array<i64: 16, 128>}]} {
    %c0 = arith.constant 0 : index
    %c0_0 = arith.constant 0 : index
    %0 = vector.load %arg1[%c0, %c0_0] : memref<16x784xbf16, #tpu.memory_space<vmem>>, vector<16x784xbf16>
    %c0_1 = arith.constant 0 : index
    %c0_2 = arith.constant 0 : index
    %1 = vector.load %arg2[%c0_1, %c0_2] : memref<784x128xbf16, #tpu.memory_space<vmem>>, vector<784x128xbf16>
    %cst = arith.constant dense<0.000000e+00> : vector<16x128xf32>
    %2 = tpu.matmul %0, %1, %cst {dimension_numbers = #tpu.dot_dimension_numbers<[1], [0], [0], [1], [0, 0, 1, 1], [], []>} : vector<16x784xbf16>, vector<784x128xbf16>, vector<16x128xf32> -> vector<16x128xf32>
    %c0_3 = arith.constant 0 : index
    %c0_4 = arith.constant 0 : index
    %3 = vector.load %arg3[%c0_3, %c0_4] : memref<1x128xf32, #tpu.memory_space<vmem>>, vector<1x128xf32>
    %4 = vector.broadcast %3 : vector<1x128xf32> to vector<16x128xf32>
    %5 = arith.addf %2, %4 : vector<16x128xf32>
    %cst_5 = arith.constant 0.000000e+00 : f32
    %6 = vector.broadcast %cst_5 : f32 to vector<16x128xf32>
    %7 = arith.maximumf %5, %6 : vector<16x128xf32>
    %8 = arith.truncf %7 : vector<16x128xf32> to vector<16x128xbf16>
    %c0_6 = arith.constant 0 : index
    %c0_7 = arith.constant 0 : index
    %9 = vector.load %arg4[%c0_6, %c0_7] : memref<128x128xbf16, #tpu.memory_space<vmem>>, vector<128x128xbf16>
    %cst_8 = arith.constant dense<0.000000e+00> : vector<16x128xf32>
    %10 = tpu.matmul %8, %9, %cst_8 {dimension_numbers = #tpu.dot_dimension_numbers<[1], [0], [0], [1], [0, 0, 1, 1], [], []>} : vector<16x128xbf16>, vector<128x128xbf16>, vector<16x128xf32> -> vector<16x128xf32>
    %c0_9 = arith.constant 0 : index
    %c0_10 = arith.constant 0 : index
    %11 = vector.load %arg5[%c0_9, %c0_10] : memref<1x128xf32, #tpu.memory_space<vmem>>, vector<1x128xf32>
    %12 = vector.broadcast %11 : vector<1x128xf32> to vector<16x128xf32>
    %13 = arith.addf %10, %12 : vector<16x128xf32>
    %cst_11 = arith.constant 0.000000e+00 : f32
    %14 = vector.broadcast %cst_11 : f32 to vector<16x128xf32>
    %15 = arith.maximumf %13, %14 : vector<16x128xf32>
    %16 = arith.truncf %15 : vector<16x128xf32> to vector<16x128xbf16>
    %c0_12 = arith.constant 0 : index
    %c0_13 = arith.constant 0 : index
    %17 = vector.load %arg6[%c0_12, %c0_13] : memref<128x128xbf16, #tpu.memory_space<vmem>>, vector<128x128xbf16>
    %cst_14 = arith.constant dense<0.000000e+00> : vector<16x128xf32>
    %18 = tpu.matmul %16, %17, %cst_14 {dimension_numbers = #tpu.dot_dimension_numbers<[1], [0], [0], [1], [0, 0, 1, 1], [], []>} : vector<16x128xbf16>, vector<128x128xbf16>, vector<16x128xf32> -> vector<16x128xf32>
    %c0_15 = arith.constant 0 : index
    %c0_16 = arith.constant 0 : index
    %19 = vector.load %arg7[%c0_15, %c0_16] : memref<1x128xf32, #tpu.memory_space<vmem>>, vector<1x128xf32>
    %20 = vector.broadcast %19 : vector<1x128xf32> to vector<16x128xf32>
    %21 = arith.addf %18, %20 : vector<16x128xf32>
    %c0_17 = arith.constant 0 : index
    %c0_18 = arith.constant 0 : index
    %22 = vector.load %arg8[%c0_17, %c0_18] : memref<16x128xf32, #tpu.memory_space<vmem>>, vector<16x128xf32>
    tpu.vector_store %arg8[%c0_17, %c0_18], %21 {strides = array<i32>} : memref<16x128xf32, #tpu.memory_space<vmem>>, vector<16x128xf32>,
    return
  }
  func.func @transform_0(%arg0: i32) -> (i32, i32) {
    %c0_i32 = arith.constant 0 : i32
    %c0_i32_0 = arith.constant 0 : i32
    return %arg0, %c0_i32 : i32, i32
  }
  func.func @transform_1(%arg0: i32) -> (i32, i32) {
    %c0_i32 = arith.constant 0 : i32
    %c0_i32_0 = arith.constant 0 : i32
    %c0_i32_1 = arith.constant 0 : i32
    return %c0_i32, %c0_i32_0 : i32, i32
  }
  func.func @transform_2(%arg0: i32) -> (i32, i32) {
    %c0_i32 = arith.constant 0 : i32
    %c0_i32_0 = arith.constant 0 : i32
    %c0_i32_1 = arith.constant 0 : i32
    return %c0_i32, %c0_i32_0 : i32, i32
  }
  func.func @transform_3(%arg0: i32) -> (i32, i32) {
    %c0_i32 = arith.constant 0 : i32
    %c0_i32_0 = arith.constant 0 : i32
    %c0_i32_1 = arith.constant 0 : i32
    return %c0_i32, %c0_i32_0 : i32, i32
  }
  func.func @transform_4(%arg0: i32) -> (i32, i32) {
    %c0_i32 = arith.constant 0 : i32
    %c0_i32_0 = arith.constant 0 : i32
    %c0_i32_1 = arith.constant 0 : i32
    return %c0_i32, %c0_i32_0 : i32, i32
  }
  func.func @transform_5(%arg0: i32) -> (i32, i32) {
    %c0_i32 = arith.constant 0 : i32
    %c0_i32_0 = arith.constant 0 : i32
    %c0_i32_1 = arith.constant 0 : i32
    return %c0_i32, %c0_i32_0 : i32, i32
  }
  func.func @transform_6(%arg0: i32) -> (i32, i32) {
    %c0_i32 = arith.constant 0 : i32
    %c0_i32_0 = arith.constant 0 : i32
    %c0_i32_1 = arith.constant 0 : i32
    return %c0_i32, %c0_i32_0 : i32, i32
  }
  func.func @transform_7(%arg0: i32) -> (i32, i32) {
    %c0_i32 = arith.constant 0 : i32
    %c0_i32_0 = arith.constant 0 : i32
    return %arg0, %c0_i32 : i32, i32
  }
}

</mosaic_0001>

<bundles_post_ra>
// kernel: tpu_custom_call.1
= control target key start
LH: loop header
LB: loop body
LE: loop exit
PB: predicated region body
PF: predicated region fallthrough
CT: control target
= control target key end

     0   :  { %12 = vsyncpa [#allocation3], 0  ;;  %s2247_s0 = inlined_call_operand.hbm [shape: bf16[32,784], index: 0, kind: input, shape index: {}]   ;;  %s2248_s1 = inlined_call_operand.hbm [shape: bf16[784,128], index: 1, kind: input, shape index: {}]   ;;  %s2249_s2 = inlined_call_operand.vmem [shape: f32[1,128], index: 2, kind: input, shape index: {}]   ;;  %s2250_s3 = inlined_call_operand.hbm [shape: bf16[128,128], index: 3, kind: input, shape index: {}]   ;;  %s2251_s4 = inlined_call_operand.vmem [shape: f32[1,128], index: 4, kind: input, shape index: {}]   ;;  %s2252_s5 = inlined_call_operand.hbm [shape: bf16[128,128], index: 5, kind: input, shape index: {}]   ;;  %s2253_s6 = inlined_call_operand.vmem [shape: f32[1,128], index: 6, kind: input, shape index: {}]   ;;  %s2254_s7 = inlined_call_operand.hbm [shape: f32[32,128], index: 7, kind: output, shape index: {}]  }
   0x1   :  { %14 = vsyncpa [#allocation3 + $0x1], 0 }
   0x2   :  { %15 = vsyncpa [#allocation6], 0 }
   0x3   :  { %16 = vsyncpa [#allocation9], 0 }
   0x4   :  { %17 = vsyncpa [#allocation4], 0 }
   0x5   :  { %19 = vsyncpa [#allocation4 + $0x1], 0  ;;  %s1937_s24 = smov 0   ;;  %s1939_s25 = smov 0  }
   0x6   :  { %s1941_s26 = smov 0   ;;  %s1943_s27 = smov 0  }
   0x7 LB: > { %s1958_s28 = sadd.s32 4294967295, %s1882_s27   ;;  %s1303_s29 = sadd.s32 4294967294, %s1882_s27   ;;  %s1882_s27 = sphi %s1943_s27, %s2280_s27   ;;  %s1878_s26 = sphi %s1941_s26, %s2279_s26   ;;  %s1874_s25 = sphi %s1939_s25, %s2278_s25   ;;  %s1870_s24 = sphi %s1937_s24, %s2277_s24  }
   0x8   : > { %p45_p0 = scmp.ne.s32.totalorder %s1874_s25, %s1870_s24  ;;  %p2255_p1 = scmp.eq.s32.totalorder %s1958_s28, 0 }
   0x9   : > { %p201_p3 = scmp.eq.s32.totalorder %s1303_s29, 1  ;;  %p1304_p5 = scmp.ge.s32.totalorder %s1882_s27, 1 }
   0xa   : > { %p1967_p4 = por %p2255_p1, %p45_p0  ;;  %p208_p7 = scmp.lt.s32.totalorder %s1882_s27, 3 }
   0xb   : > { %p1972_p6 = por %p201_p3, %p45_p0  ;;  %s1884_s10 = smov [#allocation5]  }
   0xc   : > { %s2259_s30 = scalar_select %p1967_p4, 1, 0 }
   0xd   : > { %s2260_s8 = scalar_select %p1972_p6, 1, 0 }
   0xe   : > { %p1977_p8 = pnand %p1304_p5, %p208_p7  ;;  %s220_s11 = sshll.u32 %s1884_s10, 4  ;;  %s1981_s11 = int_to_ptr.vmem [resolvable:$true] %s220_s11 }
   0xf   : > { %2261 = sst [smem:[#allocation15_spill]] %s2260_s8  ;;  %s1885_s13 = smov [#allocation7]  }
  0x10   : > { %s2262_s9 = scalar_select %p1977_p8, 1, 0 }
  0x11   : > { %p1550_p9 = pneg %p1977_p8  ;;  %s236_s14 = sshll.u32 %s1885_s13, 4  ;;  %s1992_s14 = int_to_ptr.vmem [resolvable:$true] %s236_s14 }
  0x12   : > { %s1886_s15 = smov [#allocation8]   ;;  %s1694_s19 = scalar_lea.hbm %s2248_s1, 6272 }
  0x13   : > { %p1988_p11 = pnand %p1550_p9, %p2255_p1  ;;  %s1994_s16 = sshll.u32 %s1886_s15, 4  ;;  %s253_s16 = int_to_ptr.vmem [resolvable:$true] %s1994_s16 }
  0x14   : > { %p1695_p12 = scmp.ne.s32.totalorder %s2248_s1, %s1694_s19  ;;  %p1701_p5 = scmp.lt.u32.totalorder %s1694_s19, %s2248_s1 }
  0x15   : > { %p2004_p13 = pneg %p1988_p11 }
  0x17   : > { %p1697_p0 = pnand %p2004_p13, %p1695_p12 }
  0x19   : > { %p1698_p3 = pneg %p1697_p0 }
  0x1b   : > { %p1703_p7 = pnand %p1701_p5, %p1698_p3 }
  0x1d   : > { %1706 = shalt.err (!%p1703_p7)
}
  0x1e   : > { %s1707_s10 = scalar_lea.vmem %s1981_s11, 6272  ;;  %p1715_p2 = scmp.lt.s32.totalorder %s1981_s11, %s1981_s11 }
  0x1f   : > { %p1708_p9 = scmp.ne.s32.totalorder %s1981_s11, %s1707_s10  ;;  %p1716_p6 = scmp.lt.s32.totalorder %s1707_s10, %s1707_s10 }
  0x21   : > { %p1710_p10 = pnand %p1708_p9, %p2004_p13  ;;  %p1717_p12 = por %p1716_p6, %p1715_p2 }
  0x23   : > { %p1711_p1 = pneg %p1710_p10 }
  0x25   : > { %p1718_p0 = pnand %p1717_p12, %p1711_p1 }
  0x27   : > { %1721 = shalt.err (!%p1718_p0)
}
  0x28   : > { %s1887_s13 = smov 64   ;;  %s1888_s15 = smov 4  }
  0x29   : > { %1553 = dma.hbm_to_vmem [thread:$0]  (!%p1988_p11), %s2248_s1, 6272, %s1981_s11, [#allocation6], %s1887_s13, %s1887_s13, %s1888_s15  }
  0x2a   : > { %s1722_s21 = scalar_lea.hbm %s2250_s3, 1024 }
  0x2b   : > { %p1723_p1 = scmp.ne.s32.totalorder %s2250_s3, %s1722_s21  ;;  %p1729_p10 = scmp.lt.u32.totalorder %s1722_s21, %s2250_s3 }
  0x2d   : > { %p1725_p2 = pnand %p1723_p1, %p2004_p13 }
  0x2f   : > { %p1726_p6 = pneg %p1725_p2 }
  0x31   : > { %p1731_p3 = pnand %p1729_p10, %p1726_p6 }
  0x33   : > { %1734 = shalt.err (!%p1731_p3)
}
  0x34   : > { %s1735_s11 = scalar_lea.vmem %s1992_s14, 1024  ;;  %p1743_p12 = scmp.lt.s32.totalorder %s1992_s14, %s1992_s14 }
  0x35   : > { %p1736_p5 = scmp.ne.s32.totalorder %s1992_s14, %s1735_s11  ;;  %p1744_p0 = scmp.lt.s32.totalorder %s1735_s11, %s1735_s11 }
  0x37   : > { %p1738_p7 = pnand %p1736_p5, %p2004_p13  ;;  %p1745_p1 = por %p1744_p0, %p1743_p12 }
  0x39   : > { %p1739_p9 = pneg %p1738_p7 }
  0x3b   : > { %p1746_p2 = pnand %p1745_p1, %p1739_p9 }
  0x3d   : > { %1749 = shalt.err (!%p1746_p2)
}
  0x3e   : > { %1556 = dma.hbm_to_vmem [thread:$0]  (!%p1988_p11), %s2250_s3, 1024, %s1992_s14, [#allocation6], %s1887_s13, %s1887_s13, %s1888_s15  }
  0x3f   : > { %s1750_s20 = scalar_lea.hbm %s2252_s5, 1024 }
  0x40   : > { %p1751_p6 = scmp.ne.s32.totalorder %s2252_s5, %s1750_s20  ;;  %p1757_p5 = scmp.lt.u32.totalorder %s1750_s20, %s2252_s5 }
  0x42   : > { %p1753_p10 = pnand %p1751_p6, %p2004_p13 }
  0x44   : > { %p1754_p3 = pneg %p1753_p10 }
  0x46   : > { %p1759_p7 = pnand %p1757_p5, %p1754_p3 }
  0x48   : > { %1762 = shalt.err (!%p1759_p7)
}
  0x49   : > { %s1763_s11 = scalar_lea.vmem %s253_s16, 1024  ;;  %p1771_p1 = scmp.lt.s32.totalorder %s253_s16, %s253_s16 }
  0x4a   : > { %p1764_p9 = scmp.ne.s32.totalorder %s253_s16, %s1763_s11  ;;  %p1772_p2 = scmp.lt.s32.totalorder %s1763_s11, %s1763_s11 }
  0x4c   : > { %p1766_p12 = pnand %p1764_p9, %p2004_p13  ;;  %p1773_p4 = por %p1772_p2, %p1771_p1 }
  0x4e   : > { %p1767_p0 = pneg %p1766_p12 }
  0x50   : > { %p1774_p8 = pnand %p1773_p4, %p1767_p0 }
  0x52   : > { %1777 = shalt.err (!%p1774_p8)
}
  0x53   : > { %1559 = dma.hbm_to_vmem [thread:$0]  (!%p1988_p11), %s2252_s5, 1024, %s253_s16, [#allocation9], %s1887_s13, %s1887_s13, %s1888_s15  }
  0x54   : > { %s2077_s22 = sadd.s32 1, %s1882_s27   ;;  %s32_s17 = sadd.s32 1, %s1878_s26 }
  0x55   : > { %s29_s12 = ssub.s32 %s1882_s27, %s2077_s22  ;;  %p39_p8 = scmp.ne.s32.totalorder %s1878_s26, %s1874_s25 }
  0x56   : > { %p30_p4 = scmp.eq.s32.totalorder %s29_s12, 0  ;;  %p40_p13 = scmp.eq.s32.totalorder %s1882_s27, 0 }
  0x57   : > { %p1571_p6 = scmp.lt.s32.totalorder %s1882_s27, 2  ;;  %p2265_p3 = scmp.eq.s32.totalorder %s1958_s28, 1 }
  0x58   : > { %s2087_s18 = scalar_select %p30_p4, %s1878_s26, %s32_s17  }
  0x59   : > { %p41_p10 = por %p40_p13, %p39_p8  ;;  %p2091_p5 = por %p2265_p3, %p39_p8 }
  0x5a   : > { %s269_s20 = sand.u32 1, %s1878_s26   ;;  %s1532_s21 = smul.u32 896, %s1882_s27 }
  0x5b   : > { %s1531_s16 = smul.u32 56, %s269_s20  ;;  %p2102_p11 = pnand %p1571_p6, %p41_p10 }
  0x5c   : > { %s2100_s23 = scalar_lea.hbm %s2247_s0, %s1532_s21  ;;  %s2108_s14 = scalar_lea.sflag [#allocation3], %s269_s20 }
  0x5d   : > { %s273_s10 = scalar_lea.vmem [#allocation2], %s1531_s16  ;;  %s1778_s8 = scalar_lea.hbm %s2100_s23, 896 }
  0x5e   : > { %s281_s11 = sshll.u32 %s273_s10, 4  ;;  %p1779_p7 = scmp.ne.s32.totalorder %s2100_s23, %s1778_s8  ;;  %s2106_s11 = int_to_ptr.vmem [resolvable:$true] %s281_s11 }
  0x5f   : > { %p1780_p9 = pneg %p2102_p11  ;;  %s1783_s21 = scalar_lea.hbm %s2247_s0, 1792 }
  0x60   : > { %p1784_p1 = scmp.lt.u32.totalorder %s2100_s23, %s2247_s0  ;;  %p1785_p2 = scmp.lt.u32.totalorder %s1783_s21, %s1778_s8 }
  0x61   : > { %p1781_p12 = pnand %p1780_p9, %p1779_p7  ;;  %p1787_p8 = scmp.lt.u32.totalorder %s1778_s8, %s2100_s23 }
  0x62   : > { %p1786_p4 = por %p1785_p2, %p1784_p1 }
  0x63   : > { %p1782_p0 = pneg %p1781_p12 }
  0x64   : > { %p1788_p13 = por %p1787_p8, %p1786_p4 }
  0x66   : > { %p1789_p6 = pnand %p1788_p13, %p1782_p0 }
  0x68   : > { %1792 = shalt.err (!%p1789_p6)
}
  0x69   : > { %s1793_s20 = scalar_lea.vmem %s2106_s11, 896  ;;  %s1889_s16 = smov [#allocation2]  }
  0x6a   : > { %p1794_p10 = scmp.ne.s32.totalorder %s2106_s11, %s1793_s20  ;;  %s1798_s10 = sshll.u32 %s1889_s16, 4  ;;  %s1799_s10 = int_to_ptr.vmem [resolvable:$false] %s1798_s10 }
  0x6b   : > { %s1800_s12 = scalar_lea.vmem %s1799_s10, 1792  ;;  %p1801_p12 = scmp.lt.s32.totalorder %s2106_s11, %s1799_s10 }
  0x6c   : > { %p1796_p3 = pnand %p1794_p10, %p1780_p9  ;;  %p1802_p1 = scmp.lt.s32.totalorder %s1800_s12, %s1793_s20 }
  0x6e   : > { %p1797_p7 = pneg %p1796_p3  ;;  %p1803_p2 = por %p1802_p1, %p1801_p12 }
  0x70   : > { %p1804_p4 = pnand %p1803_p2, %p1797_p7 }
  0x72   : > { %1807 = shalt.err (!%p1804_p4)
}
  0x73   : > { %s1890_s8 = smov 448   ;;  %s1891_s17 = smov 28  }
  0x74   : > { %1563 = dma.hbm_to_vmem [thread:$0]  (!%p2102_p11), %s2100_s23, 896, %s2106_s11, %s2108_s14, %s1890_s8, %s1890_s8, %s1891_s17  }
  0x75   : > { %p2268_p9 = scmp.ne.s32.totalorder %s2262_s9, 0 }
  0x76   : > { %s2139_s21 = sand.u32 (!%p2268_p9), 1, %s1874_s25   ;;  %p2269_p0 = scmp.ne.s32.totalorder (!%p2268_p9), %s2259_s30, 0 }
  0x77   : > { %293 = sbr.rel (%p2268_p9) target bundleno = 875 (0x36b), region = 48  ;;  %s296_s15 = scalar_lea.sflag (!%p2268_p9), [#allocation3], %s2139_s21 }
  0x78   : > { %s1533_s13 = smul.u32 (!%p2268_p9), 56, %s2139_s21 }
  0x7a   : > { %s2143_s20 = scalar_lea.vmem (!%p2268_p9), [#allocation2], %s1533_s13 }
  0x7e   : > { %1853 = dma.done.wait (%p2269_p0), %s296_s15, 896  }
  0x7f   : > { %1855 = vsyncadd (%p2269_p0), %s296_s15, 4294966400  ;;  %p2270_p11 = scmp.eq.s32.totalorder %s1958_s28, 0 }
  0x81   : > { %1857 = dma.done.wait (%p2270_p11), [#allocation6], 7296   ;;  %p2271_p8 = pmov %p2270_p11 }
  0x83   : > { %1859 = vsyncadd (%p2271_p8), [#allocation6], 4294960000  ;;  %p2272_p13 = pmov %p2271_p8 }
  0x84   : > { %p2273_p6 = pmov %p2271_p8 }
  0x85   : > { %1861 = dma.done.wait (%p2272_p13), [#allocation9], 1024  }
  0x86   : > { %1863 = vsyncadd (%p2273_p6), [#allocation9], 4294966272  ;;  %v1619_v0 = vld [vmem:[#allocation5 + $0x40] sm:$0xff]   ;;  %v1623_v4 = vld [vmem:[#allocation5 + $0x48] sm:$0xff]   ;;  %v1892_v38 = vmov 0.0   ;;  %vm1893_vm0 = vmmov 0  }
  0x87   : > { %v1620_v1 = vld [vmem:[#allocation5] sm:$0xff]   ;;  %1399 = vmatprep.subr.bf16.mxu0 %v1619_v0  ;;  %v1624_v5 = vld [vmem:[#allocation5 + $0x8] sm:$0xff]   ;;  %v1627_v8 = vld [vmem:[#allocation5 + $0x50] sm:$0xff]   ;;  %vm787_vm1 = vcmask 130048   ;;  %s1316_s11 = sshll.u32 %s2139_s21, 4  ;;  %s1398_s8 = sshll.u32 %s1958_s28, 8 }
  0x88   : > { %v1621_v2 = vld [vmem:[#allocation5 + $0xc0] sm:$0xff]   ;;  %1400 = vmatpush3.bf16.msra.mxu0 %v1620_v1  ;;  %v1625_v6 = vld [vmem:[#allocation5 + $0xc8] sm:$0xff]   ;;  %v1628_v9 = vld [vmem:[#allocation5 + $0x10] sm:$0xff]   ;;  %s341_s10 = scalar_lea.vmem [#allocation10], %s1316_s11  ;;  %s2203_s15 = scalar_lea.hbm %s2254_s7, %s1398_s8 }
  0x89   : > { %v1622_v3 = vld [vmem:[#allocation5 + $0x80] sm:$0xff]   ;;  %1421 = vmatprep.subr.bf16.mxu1 %v1621_v2  ;;  %1401 = vmatprep.subr.bf16.mxu0 %v1623_v4  ;;  %v1626_v7 = vld [vmem:[#allocation5 + $0x88] sm:$0xff]   ;;  %v1629_v10 = vld [vmem:[#allocation5 + $0xd0] sm:$0xff]   ;;  %s1201_s12 = sshll.u32 %s341_s10, 4  ;;  %s1894_s30 = smov [#allocation10]   ;;  %s2198_s12 = int_to_ptr.vmem [resolvable:$true] %s1201_s12 }
  0x8a   : > { %1422 = vmatpush3.bf16.msra.mxu1 %v1622_v3  ;;  %v1630_v11 = vld [vmem:[#allocation5 + $0x90] sm:$0xff]   ;;  %v1631_v12 = vld [vmem:[#allocation5 + $0x58] sm:$0xff]   ;;  %v1635_v16 = vld [vmem:[#allocation5 + $0x60] sm:$0xff]   ;;  %s1808_s28 = scalar_lea.vmem %s2198_s12, 256  ;;  %s1812_s9 = sshll.u32 %s1894_s30, 4  ;;  %s1813_s9 = int_to_ptr.vmem [resolvable:$false] %s1812_s9 }
  0x8b   : > { %1423 = vmatprep.subr.bf16.mxu1 %v1625_v6  ;;  %v1632_v13 = vld [vmem:[#allocation5 + $0x18] sm:$0xff]   ;;  %v1636_v17 = vld [vmem:[#allocation5 + $0x20] sm:$0xff]   ;;  %v1639_v20 = vld [vmem:[#allocation5 + $0x68] sm:$0xff]   ;;  %p1809_p10 = scmp.ne.s32.totalorder %s2198_s12, %s1808_s28  ;;  %s1814_s23 = scalar_lea.vmem %s1813_s9, 512 }
  0x8c   : > { %1402 = vmatpush3.bf16.msra.mxu0 %v1624_v5  ;;  %v1633_v14 = vld [vmem:[#allocation5 + $0xd8] sm:$0xff]   ;;  %v1637_v18 = vld [vmem:[#allocation5 + $0xe0] sm:$0xff]   ;;  %v1640_v21 = vld [vmem:[#allocation5 + $0x28] sm:$0xff]   ;;  %p1815_p12 = scmp.lt.s32.totalorder %s2198_s12, %s1813_s9  ;;  %p1816_p1 = scmp.lt.s32.totalorder %s1814_s23, %s1808_s28 }
  0x8d   : > { %1403 = vmatprep.subr.bf16.mxu0 %v1627_v8  ;;  %v1634_v15 = vld [vmem:[#allocation5 + $0x98] sm:$0xff]   ;;  %v1638_v19 = vld [vmem:[#allocation5 + $0xa0] sm:$0xff]   ;;  %v1641_v22 = vld [vmem:[#allocation5 + $0xe8] sm:$0xff]   ;;  %p1810_p3 = pnand %p1809_p10, %p2091_p5 }
  0x8e   : > { %1424 = vmatpush3.bf16.msra.mxu1 %v1626_v7  ;;  %v1642_v23 = vld [vmem:[#allocation5 + $0xa8] sm:$0xff]   ;;  %v1643_v24 = vld [vmem:[#allocation5 + $0x70] sm:$0xff]   ;;  %v1647_v28 = vld [vmem:[#allocation5 + $0x78] sm:$0xff]   ;;  %p1817_p2 = por %p1816_p1, %p1815_p12 }
  0x8f   : > { %1425 = vmatprep.subr.bf16.mxu1 %v1629_v10  ;;  %v1644_v25 = vld [vmem:[#allocation5 + $0x30] sm:$0xff]   ;;  %v1648_v29 = vld [vmem:[#allocation5 + $0x38] sm:$0xff]   ;;  %v1654_v34 = vld [vmem:[#allocation5 + $0x140] sm:$0xff]   ;;  %p1811_p7 = pneg %p1810_p3 }
  0x90   : > { %1404 = vmatpush3.bf16.msra.mxu0 %v1628_v9  ;;  %v1645_v26 = vld [vmem:[#allocation5 + $0xf0] sm:$0xff]   ;;  %v1649_v30 = vld [vmem:[#allocation5 + $0xf8] sm:$0xff]   ;;  %v1658_v37 = vld [vmem:[#allocation5 + $0x100] sm:$0xff]  }
  0x91   : > { %1405 = vmatprep.subr.bf16.mxu0 %v1631_v12  ;;  %v1646_v27 = vld [vmem:[#allocation5 + $0xb0] sm:$0xff]   ;;  %v1653_v33 = vld [vmem:[#allocation5 + $0xb8] sm:$0xff]   ;;  %v1659_v39 = vld [vmem:[#allocation5 + $0x148] sm:$0xff]   ;;  %p1818_p4 = pnand %p1817_p2, %p1811_p7 }
  0x92   : > { %1426 = vmatpush3.bf16.msra.mxu1 %v1630_v11  ;;  %v1650_v31 = vld [vmem:[%s2143_s20] ss:$28 sps:$4 sm:$0xff]   ;;  %v1655_v35 = vld [vmem:[%s2143_s20 + $0x8] ss:$28 sps:$4 sm:$0xff]   ;;  %v1676_v50 = vld [vmem:[%s2143_s20 + $0x14] ss:$28 sps:$4 sm:$0xff]  }
  0x93   : > { %1427 = vmatprep.subr.bf16.mxu1 %v1633_v14  ;;  %v1652_v32 = vld [vmem:[%s2143_s20 + $0x4] ss:$28 sps:$4 sm:$0xff]   ;;  %v1657_v36 = vld [vmem:[%s2143_s20 + $0xc] ss:$28 sps:$4 sm:$0xff]   ;;  %v1665_v45 = vld [vmem:[#allocation5 + $0x160] sm:$0xff]  }
  0x94   : > { %1406 = vmatpush3.bf16.msra.mxu0 %v1632_v13  ;;  %823 = vmatprep.mubr.bf16.mxu0 %v1652_v32  ;;  %v1660_v40 = vld [vmem:[#allocation5 + $0x108] sm:$0xff]   ;;  %v1661_v41 = vld [vmem:[#allocation5 + $0x150] sm:$0xff]   ;;  %v1663_v43 = vld [vmem:[#allocation5 + $0x158] sm:$0xff]  }
  0x95   : > { %1407 = vmatprep.subr.bf16.mxu0 %v1635_v16  ;;  %864 = vmatprep.mubr.bf16.mxu1 %v1657_v36  ;;  %v1662_v42 = vld [vmem:[#allocation5 + $0x110] sm:$0xff]   ;;  %v1664_v44 = vld [vmem:[#allocation5 + $0x118] sm:$0xff]   ;;  %v1666_v46 = vld [vmem:[#allocation5 + $0x120] sm:$0xff]  }
  0x96   : > { %1428 = vmatpush3.bf16.msra.mxu1 %v1634_v15  ;;  %v1667_v47 = vld [vmem:[#allocation5 + $0x168] sm:$0xff]   ;;  %v1673_v48 = vld [vmem:[#allocation5 + $0x180] sm:$0xff]   ;;  %v1669_v51 = vld [vmem:[#allocation5 + $0x170] sm:$0xff]  }
  0x97   : > { %1429 = vmatprep.subr.bf16.mxu1 %v1637_v18  ;;  %v1668_v49 = vld [vmem:[#allocation5 + $0x128] sm:$0xff]   ;;  %v1670_v53 = vld [vmem:[#allocation5 + $0x130] sm:$0xff]   ;;  %v1671_v54 = vld [vmem:[#allocation5 + $0x178] sm:$0xff]  }
  0x98   : > { %1408 = vmatpush3.bf16.msra.mxu0 %v1636_v17  ;;  %v1677_v52 = vld [vmem:[%s2143_s20 + $0x18] ss:$28 sps:$4 sm:$0xff]   ;;  %v1674_v56 = vld [vmem:[%s2143_s20 + $0x10] ss:$28 sps:$4 sm:$0xff]   ;;  %v1317_v8 = vld [vmem:[%s2249_s2] ss:$0 sm:$0xff] }
  0x99   : > { %1409 = vmatprep.subr.bf16.mxu0 %v1639_v20  ;;  %v1672_v55 = vld [vmem:[#allocation5 + $0x138] sm:$0xff]   ;;  %v1678_v57 = vld [vmem:[#allocation7] sm:$0xff]   ;;  %v1679_v58 = vld [vmem:[#allocation7 + $0x8] sm:$0xff]   ;;  %s1188_s20 = scalar_lea.sflag [#allocation4], %s2139_s21 }
  0x9a   : > { %1430 = vmatpush3.bf16.msra.mxu1 %v1638_v19  ;;  %v1680_v59 = vld [vmem:[#allocation7 + $0x10] sm:$0xff]   ;;  %v1681_v60 = vld [vmem:[#allocation7 + $0x18] sm:$0xff]   ;;  %v1682_v61 = vld [vmem:[#allocation7 + $0x20] sm:$0xff]  }
  0x9b   : > { %1431 = vmatprep.subr.bf16.mxu1 %v1641_v22  ;;  %v1683_v62 = vld [vmem:[#allocation7 + $0x28] sm:$0xff]   ;;  %v1684_v63 = vld [vmem:[#allocation7 + $0x30] sm:$0xff]   ;;  %v1685_v0 = vld [vmem:[#allocation7 + $0x38] sm:$0xff]  }
  0x9c   : > { %1410 = vmatpush3.bf16.msra.mxu0 %v1640_v21  ;;  %v1686_v1 = vld [vmem:[#allocation8] sm:$0xff]   ;;  %v1687_v2 = vld [vmem:[#allocation8 + $0x8] sm:$0xff]   ;;  %v1688_v3 = vld [vmem:[#allocation8 + $0x10] sm:$0xff]  }
  0x9d   : > { %1411 = vmatprep.subr.bf16.mxu0 %v1643_v24  ;;  %v1689_v4 = vld [vmem:[#allocation8 + $0x18] sm:$0xff]   ;;  %v1690_v5 = vld [vmem:[#allocation8 + $0x20] sm:$0xff]   ;;  %v1691_v6 = vld [vmem:[#allocation8 + $0x28] sm:$0xff]  }
  0x9e   : > { %1432 = vmatpush3.bf16.msra.mxu1 %v1642_v23 }
  0x9f   : > { %1433 = vmatprep.subr.bf16.mxu1 %v1645_v26 }
  0xa0   : > { %1412 = vmatpush3.bf16.msra.mxu0 %v1644_v25 }
  0xa1   : > { %1413 = vmatprep.subr.bf16.mxu0 %v1647_v28 }
  0xa2   : > { %1434 = vmatpush3.bf16.msra.mxu1 %v1646_v27 }
  0xa3   : > { %1435 = vmatprep.subr.bf16.mxu1 %v1649_v30 }
  0xa4   : > { %1414 = vmatpush3.bf16.msra.mxu0 %v1648_v29 }
  0xa5   : > { %1443 = vmatprep.subr.bf16.mxu0 %v1654_v34 }
  0xa6   : > { %1436 = vmatpush3.bf16.msra.mxu1 %v1653_v33 }
  0xa7   : > { %824 = vmatmul.mubr.bf16.vlgmr.msra.gmra.mrb[0].mxu0 %v1650_v31  ;;  %1485 = vmatprep.subr.bf16.mxu1 %v1892_v38 }
  0xa8   : > { %1444 = vmatpush3.bf16.msra.mxu0 %v1658_v37  ;;  %905 = vmatprep.mubr.bf16.mxu0 %v1676_v50 }
  0xa9   : > { %865 = vmatmul.mubr.bf16.vlgmr.msra.gmra.mrb[0].mxu1 %v1655_v35  ;;  %1445 = vmatprep.subr.bf16.mxu0 %v1659_v39 }
  0xaa   : > { %1487 = vmatprep.mubr.msk.bf16.mxu1 %vm1893_vm0, %v1892_v38  ;;  %1486 = vmatpush3.bf16.msra.mxu1 %v1673_v48 }
  0xab   : > { %1491 = vmatprep.subr.bf16.mxu1 %v1892_v38 }
  0xac   : > { %1446 = vmatpush3.bf16.msra.mxu0 %v1660_v40 }
  0xad   : > { %1447 = vmatprep.subr.bf16.mxu0 %v1661_v41 }
  0xb0   : > { %1448 = vmatpush3.bf16.msra.mxu0 %v1662_v42  ;;  %v1692_v42 = vld [vmem:[#allocation8 + $0x30] sm:$0xff]  }
  0xb1   : > { %1449 = vmatprep.subr.bf16.mxu0 %v1663_v43  ;;  %1488 = vmatmul.mubr.msk.bf16.vlgmr.msra.gmra.mrb[4].mxu1 %vm787_vm1, %v1677_v52  ;;  %v1693_v43 = vld [vmem:[#allocation8 + $0x38] sm:$0xff]  }
  0xb2   : > { %1507 = vmatprep.mubr.msk.bf16.mxu1 %vm1893_vm0, %v1892_v38  ;;  %1492 = vmatpush3.bf16.msra.mxu1 %v1678_v57 }
  0xb3   : > { %1493 = vmatprep.subr.bf16.mxu1 %v1892_v38 }
  0xb4   : > { %1450 = vmatpush3.bf16.msra.mxu0 %v1664_v44  ;;  %v1375_v44 = vld [vmem:[%s2251_s4] ss:$0 sm:$0xff] }
  0xb5   : > { %1451 = vmatprep.subr.bf16.mxu0 %v1665_v45 }
  0xb6   : > { %1494 = vmatpush3.bf16.msra.mxu1 %v1679_v58 }
  0xb7   : > { %1495 = vmatprep.subr.bf16.mxu1 %v1892_v38 }
  0xb8   : > { %1452 = vmatpush3.bf16.msra.mxu0 %v1666_v46 }
  0xb9   : > { %1453 = vmatprep.subr.bf16.mxu0 %v1667_v47 }
  0xba   : > { %1496 = vmatpush3.bf16.msra.mxu1 %v1680_v59 }
  0xbb   : > { %1497 = vmatprep.subr.bf16.mxu1 %v1892_v38 }
  0xbc   : > { %1454 = vmatpush3.bf16.msra.mxu0 %v1668_v49 }
  0xbd   : > { %1455 = vmatprep.subr.bf16.mxu0 %v1669_v51 }
  0xbe   : > { %1498 = vmatpush3.bf16.msra.mxu1 %v1681_v60 }
  0xbf   : > { %1499 = vmatprep.subr.bf16.mxu1 %v1892_v38 }
  0xc0   : > { %1456 = vmatpush3.bf16.msra.mxu0 %v1670_v53 }
  0xc1   : > { %1457 = vmatprep.subr.bf16.mxu0 %v1671_v54 }
  0xc2   : > { %1500 = vmatpush3.bf16.msra.mxu1 %v1682_v61 }
  0xc3   : > { %1501 = vmatprep.subr.bf16.mxu1 %v1892_v38 }
  0xc4   : > { %1458 = vmatpush3.bf16.msra.mxu0 %v1672_v55 }
  0xc5   : > { %1511 = vmatprep.subr.bf16.mxu0 %v1892_v38 }
  0xc6   : > { %1502 = vmatpush3.bf16.msra.mxu1 %v1683_v62 }
  0xc7   : > { %906 = vmatmul.mubr.bf16.vlgmr.msra.gmra.mrb[4].mxu0 %v1674_v56  ;;  %1503 = vmatprep.subr.bf16.mxu1 %v1892_v38 }
  0xc8   : > { %1527 = vmatprep.mubr.msk.bf16.mxu0 %vm1893_vm0, %v1892_v38  ;;  %1512 = vmatpush3.bf16.msra.mxu0 %v1686_v1 }
  0xc9   : > { %1513 = vmatprep.subr.bf16.mxu0 %v1892_v38 }
  0xca   : > { %1504 = vmatpush3.bf16.msra.mxu1 %v1684_v63 }
  0xcb   : > { %1505 = vmatprep.subr.bf16.mxu1 %v1892_v38 }
  0xcc   : > { %1514 = vmatpush3.bf16.msra.mxu0 %v1687_v2 }
  0xcd   : > { %1515 = vmatprep.subr.bf16.mxu0 %v1892_v38 }
  0xce   : > { %1506 = vmatpush3.bf16.msra.mxu1 %v1685_v0 }
  0xd0   : > { %1516 = vmatpush3.bf16.msra.mxu0 %v1688_v3 }
  0xd1   : > { %1517 = vmatprep.subr.bf16.mxu0 %v1892_v38 }
  0xd4   : > { %1518 = vmatpush3.bf16.msra.mxu0 %v1689_v4 }
  0xd5   : > { %1519 = vmatprep.subr.bf16.mxu0 %v1892_v38 }
  0xd8   : > { %1520 = vmatpush3.bf16.msra.mxu0 %v1690_v5 }
  0xd9   : > { %1521 = vmatprep.subr.bf16.mxu0 %v1892_v38 }
  0xdc   : > { %1522 = vmatpush3.bf16.msra.mxu0 %v1691_v6 }
  0xdd   : > { %1523 = vmatprep.subr.bf16.mxu0 %v1892_v38 }
  0xe0   : > { %1524 = vmatpush3.bf16.msra.mxu0 %v1692_v42 }
  0xe1   : > { %1525 = vmatprep.subr.bf16.mxu0 %v1892_v38  ;;  %v1384_v38 = vld [vmem:[%s2253_s6] ss:$0 sm:$0xff] }
  0xe4   : > { %1526 = vmatpush3.bf16.msra.mxu0 %v1693_v43 }
 0x17a   : > { %v1415_v7 = vpop.f32.mrb[0].mxu0 }
 0x17b   : > { %v1416_v9 = vpop.f32.mrb[1].mxu0 }
 0x17c   : > { %v1417_v10 = vadd.f32 %v1416_v9, %v1415_v7  ;;  %v1418_v11 = vpop.f32.mrb[2].mxu0  ;;  %v1437_v12 = vpop.f32.mrb[0].mxu1 }
 0x17d   : > { %v1419_v13 = vpop.f32.mrb[3].mxu0  ;;  %v1438_v16 = vpop.f32.mrb[1].mxu1 }
 0x17e   : > { %v826_v14 = vadd.f32 %v1417_v10, %v1317_v8  ;;  %v1420_v15 = vadd.f32 %v1419_v13, %v1418_v11  ;;  %v1439_v17 = vadd.f32 %v1438_v16, %v1437_v12  ;;  %v1440_v18 = vpop.f32.mrb[2].mxu1 }
 0x17f   : > { %v1441_v20 = vpop.f32.mrb[3].mxu1 }
 0x180   : > { %v829_v19 = vadd.f32 %v1420_v15, %v1317_v8  ;;  %v867_v21 = vadd.f32 %v1439_v17, %v826_v14  ;;  %v1442_v22 = vadd.f32 %v1441_v20, %v1440_v18 }
 0x182   : > { %v870_v23 = vadd.f32 %v1442_v22, %v829_v19 }
 0x184   : > { %v948_v24 = vpop.f32.mrb[4].mxu1 }
 0x185   : > { %v1489_v25 = vpop.f32.mrb[5].mxu1 }
 0x186   : > { %v951_v26 = vpop.f32.mrb[6].mxu1 }
 0x187   : > { %v1490_v27 = vpop.f32.mrb[7].mxu1 }
 0x19a   : > { %v1459_v28 = vpop.f32.mrb[4].mxu0 }
 0x19b   : > { %v1460_v29 = vpop.f32.mrb[5].mxu0 }
 0x19c   : > { %v1461_v30 = vadd.f32 %v1460_v29, %v1459_v28  ;;  %v1462_v31 = vpop.f32.mrb[6].mxu0 }
 0x19d   : > { %v1463_v32 = vpop.f32.mrb[7].mxu0 }
 0x19e   : > { %v908_v33 = vadd.f32 %v1461_v30, %v867_v21  ;;  %v1464_v34 = vadd.f32 %v1463_v32, %v1462_v31 }
 0x1a0   : > { %v949_v35 = vadd.f32 %v948_v24, %v908_v33  ;;  %v911_v36 = vadd.f32 %v1464_v34, %v870_v23 }
 0x1a2   : > { %v952_v37 = vadd.f32 %v951_v26, %v911_v36  ;;  %v955_v39 = vmax.f32 %v949_v35, 0.0 }
 0x1a4   : > { %v956_v40 = vmax.f32 %v952_v37, 0.0 }
 0x1a6   : > { %v957_v41 = vpack.c.bf16 %v956_v40, %v955_v39 }
 0x1a8   : > { %1508 = vmatmul.mubr.bf16.vlgmr.msra.gmra.mrb[8].mxu1 %v957_v41 }
 0x27b   : > { %v1063_v45 = vpop.f32.mrb[8].mxu1 }
 0x27c   : > { %v1064_v46 = vadd.f32 %v1375_v44, %v1063_v45  ;;  %v1509_v47 = vpop.f32.mrb[9].mxu1 }
 0x27d   : > { %v1066_v48 = vpop.f32.mrb[10].mxu1 }
 0x27e   : > { %v1067_v49 = vadd.f32 %v1375_v44, %v1066_v48  ;;  %v1510_v50 = vpop.f32.mrb[11].mxu1  ;;  %v1070_v51 = vmax.f32 %v1064_v46, 0.0 }
 0x280   : > { %v1071_v52 = vmax.f32 %v1067_v49, 0.0 }
 0x282   : > { %v1072_v53 = vpack.c.bf16 %v1071_v52, %v1070_v51 }
 0x284   : > { %1528 = vmatmul.mubr.bf16.vlgmr.msra.gmra.mrb[8].mxu0 %v1072_v53 }
 0x357   : > { %v1178_v54 = vpop.f32.mrb[8].mxu0 }
 0x358   : > { %v1179_v55 = vadd.f32 %v1384_v38, %v1178_v54  ;;  %v1529_v56 = vpop.f32.mrb[9].mxu0 }
 0x359   : > { %v1181_v57 = vpop.f32.mrb[10].mxu0 }
 0x35a   : > { %1185 = vst [vmem:[%s341_s10] sm:$0xff] %v1179_v55  ;;  %v1182_v58 = vadd.f32 %v1384_v38, %v1181_v57  ;;  %v1530_v59 = vpop.f32.mrb[11].mxu0 }
 0x35c   : > { %1186 = vst [vmem:[%s341_s10 + $0x8] sm:$0xff] %v1182_v58 }
 0x35d   : > { %1821 = shalt.err (!%p1818_p4)
}
 0x35e   : > { %s1822_s29 = scalar_lea.hbm %s2203_s15, 256  ;;  %s1826_s16 = scalar_lea.hbm %s2254_s7, 512 }
 0x35f   : > { %p1823_p9 = scmp.ne.s32.totalorder %s2203_s15, %s1822_s29  ;;  %p1827_p8 = scmp.lt.u32.totalorder %s2203_s15, %s2254_s7 }
 0x360   : > { %p1828_p13 = scmp.lt.u32.totalorder %s1826_s16, %s1822_s29  ;;  %p1830_p10 = scmp.lt.u32.totalorder %s1822_s29, %s2203_s15 }
 0x361   : > { %p1824_p0 = pnand %p1823_p9, %p2091_p5 }
 0x362   : > { %p1829_p6 = por %p1828_p13, %p1827_p8 }
 0x363   : > { %p1825_p11 = pneg %p1824_p0 }
 0x364   : > { %p1831_p3 = por %p1830_p10, %p1829_p6 }
 0x366   : > { %p1832_p7 = pnand %p1831_p3, %p1825_p11 }
 0x368   : > { %1835 = shalt.err (!%p1832_p7)
}
 0x369   : > { %s1895_s17 = smov 128   ;;  %s1896_s13 = smov 8  }
 0x36a   : > { %1548 = dma.vmem_to_hbm [thread:$0]  (%p2091_p5), %s2198_s12, 256, %s2203_s15, %s1188_s20, %s1895_s17, %s1895_s17, %s1896_s13  }
 0x36b PF: > { %s2274_s28 = sld [smem:[#allocation15_spill]]  ;;  %s1216_s30 = sand.u32 1, %s1870_s24  }
 0x36c   : > { %p2276_p1 = scmp.ge.s32.totalorder %s1882_s27, 2  ;;  %s1217_s9 = scalar_lea.sflag [#allocation4], %s1216_s30 }
 0x371   : > { %p2275_p12 = scmp.ne.s32.totalorder %s2274_s28, 0 }
 0x373   : > { %p1565_p2 = pnand %p2276_p1, %p2275_p12 }
 0x375   : > { %1865 = dma.done.wait (!%p1565_p2), %s1217_s9, 256  }
 0x376   : > { %1867 = vsyncadd (!%p1565_p2), %s1217_s9, 4294967040  ;;  %p22_p4 = scmp.ge.s32.totalorder %s2077_s22, 4   ;;  %s2277_s24 = smov %s1874_s25 }
 0x377   : > { %s2278_s25 = smov %s1878_s26  ;;  %s2279_s26 = smov %s2087_s18 }
 0x378   : > { %s2280_s27 = smov %s2077_s22  ;;  %24 = sbr.rel (!%p22_p4) target bundleno = 7 (0x7), region = 105 }
 0x37f   :  { %1222 = vsyncpa [#allocation3], 1 }
 0x380   :  { %1224 = vsyncpa [#allocation3 + $0x1], 1 }
 0x381   :  { %1225 = vsyncpa [#allocation6], 1 }
 0x382   :  { %1226 = vsyncpa [#allocation9], 1 }
 0x383   :  { %1227 = vsyncpa [#allocation4], 1 }
 0x384   :  { %1229 = vsyncpa [#allocation4 + $0x1], 1 }

</bundles_post_ra>
